<compile_context>
chip_gen: v7x
topology: tpu7x:2x2x1
jax: 0.10.0
libtpu: 0.0.40
codegen_flags: <defaults>
</compile_context>

<pallas_src>
import functools
import math

import jax
import jax.numpy as jnp
from jax.experimental import pallas as pl
from jax.experimental.pallas import tpu as pltpu


def _round_up(x: int, m: int) -> int:
    return (x + m - 1) // m * m


def _make_diffrate_kernel(training: bool, tau: float, is_hard: bool, threshold: float):
    tau = float(tau)
    thr_logit = math.log(threshold / (1.0 - threshold)) if is_hard else 0.0

    def kernel(*refs):
        if training:
            x_ref, w_ref, b_ref, noise_ref, o_ref = refs
        else:
            x_ref, w_ref, b_ref, o_ref = refs

        # logits = x @ W^T + b   (bf16 operands, f32 MXU accumulation)
        z = jnp.dot(x_ref[...], w_ref[...], preferred_element_type=jnp.float32)
        z = z + b_ref[...]                       # (1, Cp) broadcast over rows

        if training:
            # logistic noise == Gumbel(0,1) - Gumbel(0,1); one draw instead of two.
            z = z + noise_ref[...].astype(jnp.float32)

        if is_hard:
            # sigmoid((z)/tau) > t  <=>  z > tau * logit(t)   (eval: tau factor = 1)
            cut = jnp.float32(thr_logit * (tau if training else 1.0))
            ret = (z > cut).astype(jnp.float32)
        else:
            if training:
                z = z * jnp.float32(1.0 / tau)
            ret = jax.nn.sigmoid(z)

        o_ref[...] = ret.astype(o_ref.dtype)

    return kernel


@functools.partial(
    jax.jit,
    static_argnames=("tau", "is_hard", "threshold", "training", "block_rows", "out_dtype"),
)
def diffrate_forward(x, w_t, b, rng=None, *, tau=5.0, is_hard=True, threshold=0.5,
                     training=False, block_rows=1024, out_dtype=jnp.bfloat16):
    """x: [B, N, dim]; w_t: [dim, C] (torch weight transposed); b: [C]."""
    B, N, dim = x.shape
    C = w_t.shape[1]
    BN = B * N
    Cp = _round_up(C, 128)           # lane-dense output width

    x2d = x.reshape(BN, dim).astype(jnp.bfloat16)
    w_p = w_t.astype(jnp.bfloat16)
    b_p = b.astype(jnp.float32).reshape(1, C)
    if Cp != C:
        w_p = jnp.pad(w_p, ((0, 0), (0, Cp - C)))
        b_p = jnp.pad(b_p, ((0, 0), (0, Cp - C)))

    tm = min(int(block_rows), _round_up(BN, 8))   # row tile (multiple of 8)
    grid = (pl.cdiv(BN, tm),)

    kernel = _make_diffrate_kernel(training, float(tau), bool(is_hard), float(threshold))

    in_specs = [
        pl.BlockSpec((tm, dim), lambda i: (i, 0)),   # x rows, streamed
        pl.BlockSpec((dim, Cp), lambda i: (0, 0)),   # W^T, resident
        pl.BlockSpec((1, Cp), lambda i: (0, 0)),     # bias row, resident
    ]
    args = [x2d, w_p, b_p]

    if training:
        if rng is None:
            raise ValueError("training=True requires an rng key")
        noise = jax.random.logistic(rng, (BN, Cp), dtype=jnp.float32).astype(jnp.bfloat16)
        in_specs.append(pl.BlockSpec((tm, Cp), lambda i: (i, 0)))
        args.append(noise)

    out_itemsize = jnp.dtype(out_dtype).itemsize
    cost = pl.CostEstimate(
        flops=2 * BN * dim * Cp,
        transcendentals=0 if is_hard else BN * Cp,
        bytes_accessed=(x2d.size * 2 + w_p.size * 2 + b_p.size * 4
                        + (BN * Cp * 2 if training else 0)
                        + BN * Cp * out_itemsize),
    )

    out = pl.pallas_call(
        kernel,
        out_shape=jax.ShapeDtypeStruct((BN, Cp), out_dtype),
        grid=grid,
        in_specs=in_specs,
        out_specs=pl.BlockSpec((tm, Cp), lambda i: (i, 0)),
        compiler_params=pltpu.CompilerParams(dimension_semantics=("parallel",)),
        cost_estimate=cost,
    )(*args)

    if Cp != C:
        out = out[:, :C]
    return out.reshape(B, N, C)


if __name__ == "__main__":
    # Small shapes consistent with DiffRate(dim, channel_number)
    B, N = 2, 8
    DIM, CHANNEL = 32, 64
    TAU, THRESHOLD = 5.0, 0.5

    key = jax.random.PRNGKey(0)
    kx, kw, kb, kn = jax.random.split(key, 4)

    x = jax.random.normal(kx, (B, N, DIM), dtype=jnp.float32)

    # nn.Linear-style init: U(-1/sqrt(dim), 1/sqrt(dim)); torch layout (out, in)
    bound = 1.0 / math.sqrt(DIM)
    w = jax.random.uniform(kw, (CHANNEL, DIM), minval=-bound, maxval=bound, dtype=jnp.float32)
    b = jax.random.uniform(kb, (CHANNEL,), minval=-bound, maxval=bound, dtype=jnp.float32)
    w_t = w.T                                        # (dim, channel) for the kernel

    # Reference with the same bf16 operand quantization (f32 accumulate).
    x_q = x.astype(jnp.bfloat16).astype(jnp.float32)
    w_q = w_t.astype(jnp.bfloat16).astype(jnp.float32)
    logits_ref = jnp.einsum("bnd,dc->bnc", x_q, w_q) + b
    ref_soft = jax.nn.sigmoid(logits_ref)

    # --- eval mode, soft gate (deterministic) ---
    out_soft = diffrate_forward(x, w_t, b, tau=TAU, is_hard=False,
                                threshold=THRESHOLD, training=False)
    jax.block_until_ready(out_soft)
    assert out_soft.shape == (B, N, CHANNEL)
    assert jnp.allclose(out_soft.astype(jnp.float32), ref_soft, atol=1e-2), \
        "eval soft-gate mismatch vs reference"

    # --- eval mode, hard gate (deterministic) ---
    out_hard = diffrate_forward(x, w_t, b, tau=TAU, is_hard=True,
                                threshold=THRESHOLD, training=False)
    jax.block_until_ready(out_hard)
    out_hard_f = out_hard.astype(jnp.float32)
    ref_hard = (ref_soft > THRESHOLD).astype(jnp.float32)
    stable = jnp.abs(ref_soft - THRESHOLD) > 1e-3     # ignore knife-edge values
    assert bool(jnp.all((out_hard_f == 0.0) | (out_hard_f == 1.0)))
    assert bool(jnp.all(jnp.where(stable, out_hard_f == ref_hard, True))), \
        "eval hard-gate mismatch vs reference"

    # --- training mode (stochastic logistic noise), hard gate ---
    out_train = diffrate_forward(x, w_t, b, kn, tau=TAU, is_hard=True,
                                 threshold=THRESHOLD, training=True)
    jax.block_until_ready(out_train)
    out_train_f = out_train.astype(jnp.float32)
    assert out_train.shape == (B, N, CHANNEL)
    assert bool(jnp.all((out_train_f == 0.0) | (out_train_f == 1.0)))

    print("KERNEL_OK")
</pallas_src>

<mosaic_0001>
module attributes {stable_mosaic.version = 11 : i64} {
  func.func @kernel(%arg0: i32, %arg1: memref<16x32xbf16, #tpu.memory_space<vmem>>, %arg2: memref<32x128xbf16, #tpu.memory_space<vmem>>, %arg3: memref<1x128xf32, #tpu.memory_space<vmem>>, %arg4: memref<16x128xbf16, #tpu.memory_space<vmem>>) attributes {dimension_semantics = [#tpu.dimension_semantics<parallel>], iteration_bounds = array<i64: 1>, scalar_prefetch = 0 : i64, scratch_operands = 0 : i64, tpu.core_type = #tpu.core_type<tc>, window_params = [{transform_indices = @transform_0, window_bounds = array<i64: 16, 32>}, {pipeline_mode = #tpu.pipeline_mode<synchronous>, transform_indices = @transform_1, window_bounds = array<i64: 32, 128>}, {pipeline_mode = #tpu.pipeline_mode<synchronous>, transform_indices = @transform_2, window_bounds = array<i64: 1, 128>}, {transform_indices = @transform_3, window_bounds = array<i64: 16, 128>}]} {
    %c0 = arith.constant 0 : index
    %c0_0 = arith.constant 0 : index
    %0 = vector.load %arg1[%c0, %c0_0] : memref<16x32xbf16, #tpu.memory_space<vmem>>, vector<16x32xbf16>
    %c0_1 = arith.constant 0 : index
    %c0_2 = arith.constant 0 : index
    %1 = vector.load %arg2[%c0_1, %c0_2] : memref<32x128xbf16, #tpu.memory_space<vmem>>, vector<32x128xbf16>
    %cst = arith.constant dense<0.000000e+00> : vector<16x128xf32>
    %2 = tpu.matmul %0, %1, %cst {dimension_numbers = #tpu.dot_dimension_numbers<[1], [0], [0], [1], [0, 0, 1, 1], [], []>} : vector<16x32xbf16>, vector<32x128xbf16>, vector<16x128xf32> -> vector<16x128xf32>
    %c0_3 = arith.constant 0 : index
    %c0_4 = arith.constant 0 : index
    %3 = vector.load %arg3[%c0_3, %c0_4] : memref<1x128xf32, #tpu.memory_space<vmem>>, vector<1x128xf32>
    %4 = vector.broadcast %3 : vector<1x128xf32> to vector<16x128xf32>
    %5 = arith.addf %2, %4 : vector<16x128xf32>
    %6 = arith.negf %5 : vector<16x128xf32>
    %7 = math.exp %6 : vector<16x128xf32>
    %cst_5 = arith.constant 1.000000e+00 : f32
    %8 = vector.broadcast %cst_5 : f32 to vector<16x128xf32>
    %9 = arith.addf %8, %7 : vector<16x128xf32>
    %10 = arith.divf %8, %9 : vector<16x128xf32>
    %11 = arith.truncf %10 : vector<16x128xf32> to vector<16x128xbf16>
    %c0_6 = arith.constant 0 : index
    %c0_7 = arith.constant 0 : index
    %12 = vector.load %arg4[%c0_6, %c0_7] : memref<16x128xbf16, #tpu.memory_space<vmem>>, vector<16x128xbf16>
    tpu.vector_store %arg4[%c0_6, %c0_7], %11 {strides = array<i32>} : memref<16x128xbf16, #tpu.memory_space<vmem>>, vector<16x128xbf16>,
    return
  }
  func.func @transform_0(%arg0: i32) -> (i32, i32) {
    %c0_i32 = arith.constant 0 : i32
    %c0_i32_0 = arith.constant 0 : i32
    return %arg0, %c0_i32 : i32, i32
  }
  func.func @transform_1(%arg0: i32) -> (i32, i32) {
    %c0_i32 = arith.constant 0 : i32
    %c0_i32_0 = arith.constant 0 : i32
    %c0_i32_1 = arith.constant 0 : i32
    return %c0_i32, %c0_i32_0 : i32, i32
  }
  func.func @transform_2(%arg0: i32) -> (i32, i32) {
    %c0_i32 = arith.constant 0 : i32
    %c0_i32_0 = arith.constant 0 : i32
    %c0_i32_1 = arith.constant 0 : i32
    return %c0_i32, %c0_i32_0 : i32, i32
  }
  func.func @transform_3(%arg0: i32) -> (i32, i32) {
    %c0_i32 = arith.constant 0 : i32
    %c0_i32_0 = arith.constant 0 : i32
    return %arg0, %c0_i32 : i32, i32
  }
}

</mosaic_0001>

<bundles_post_ra>
// kernel: diffrate_forward.1
= control target key start
LH: loop header
LB: loop body
LE: loop exit
PB: predicated region body
PF: predicated region fallthrough
CT: control target
= control target key end

     0   :  { %v156_v0 = vmov 0.0   ;;  %vm157_vm0 = vmmov 0   ;;  %vm45_vm1 = vcmask 261120   ;;  %s193_s1 = inlined_call_operand.vmem [shape: bf16[32,128], index: 1, kind: input, shape index: {}]   ;;  %s194_s0 = inlined_call_operand.vmem [shape: bf16[16,32], index: 0, kind: input, shape index: {}]   ;;  %s195_s2 = inlined_call_operand.vmem [shape: f32[1,128], index: 2, kind: input, shape index: {}]   ;;  %s196_s3 = inlined_call_operand.vmem [shape: bf16[16,128], index: 3, kind: output, shape index: {}]  }
   0x1   :  { %135 = vmatprep.subr.bf16.mxu0 %v156_v0  ;;  %v145_v1 = vld [vmem:[%s193_s1] sm:$0xff]   ;;  %139 = vmatprep.mubr.msk.bf16.mxu0 %vm157_vm0, %v156_v0  ;;  %v146_v2 = vld [vmem:[%s193_s1 + $0x8] sm:$0xff]  }
   0x2   :  { %136 = vmatpush3.bf16.msra.mxu0 %v145_v1  ;;  %v147_v3 = vld [vmem:[%s194_s0] sm:$0xff]  }
   0x3   :  { %137 = vmatprep.subr.bf16.mxu0 %v156_v0  ;;  %v116_v4 = vld [vmem:[%s195_s2] ss:$0 sm:$0xff] }
   0x6   :  { %138 = vmatpush3.bf16.msra.mxu0 %v146_v2 }
   0x9   :  { %140 = vmatmul.mubr.msk.bf16.vlgmr.msra.gmra.mrb[0].mxu0 %vm45_vm1, %v147_v3 }
  0xdc   :  { %v83_v5 = vpop.f32.mrb[0].mxu0 }
  0xdd   :  { %v84_v6 = vadd.f32 %v116_v4, %v83_v5  ;;  %v141_v7 = vpop.f32.mrb[1].mxu0 }
  0xde   :  { %v86_v8 = vpop.f32.mrb[2].mxu0 }
  0xdf   :  { %v121_v9 = vmul.f32 -1.442695, %v84_v6  ;;  %v87_v10 = vadd.f32 %v116_v4, %v86_v8  ;;  %v142_v11 = vpop.f32.mrb[3].mxu0 }
  0xe1   :  { %148 = vpow2.f32 %v121_v9  ;;  %v122_v12 = vmul.f32 -1.442695, %v87_v10 }
  0xe3   :  { %150 = vpow2.f32 %v122_v12 }
  0xeb   :  { %v149_v13 = vpop.eup %148 }
  0xec   :  { %v96_v14 = vadd.f32 1.0, %v149_v13 }
  0xed   :  { %v151_v15 = vpop.eup %150 }
  0xee   :  { %v97_v16 = vadd.f32 1.0, %v151_v15  ;;  %152 = vrcp.f32 %v96_v14 }
  0xf0   :  { %154 = vrcp.f32 %v97_v16 }
  0xf8   :  { %v153_v17 = vpop.eup %152 }
  0xfa   :  { %v155_v18 = vpop.eup %154 }
  0xfb   :  { %v130_v19 = vpack.c.bf16 %v155_v18, %v153_v17 }
  0xfd   :  { %131 = vst [vmem:[%s196_s3] sm:$0xff] %v130_v19  }

</bundles_post_ra>
